<compile_context>
chip_gen: v7x
topology: tpu7x:2x2x1
jax: 0.10.0
libtpu: 0.0.40
codegen_flags: <defaults>
</compile_context>

<pallas_src>
import functools

import jax
import jax.numpy as jnp
from jax.experimental import pallas as pl
from jax.experimental.pallas import tpu as pltpu

EPS = 1e-5            # torch.nn.InstanceNorm2d default eps
LEAKY_SLOPE = 0.2
LANE = 128
CBLK = 128            # output-channel block (lane-dense)


# --------------------------------------------------------------------------------------
# small helpers
# --------------------------------------------------------------------------------------
def _ceil_to(x, m):
    return (x + m - 1) // m * m


def _vmem_bytes(shape, dtype):
    """VMEM footprint of a block with lane (128) and sublane (8/16/32) padding."""
    itemsize = jnp.dtype(dtype).itemsize
    sub = {4: 8, 2: 16, 1: 32}.get(itemsize, 8)
    shape = tuple(int(d) for d in shape)
    if len(shape) == 1:
        shape = (1,) + shape
    lead = 1
    for d in shape[:-2]:
        lead *= d
    return lead * _ceil_to(shape[-2], sub) * _ceil_to(shape[-1], 128) * itemsize


def _vmem_capacity_bytes():
    try:
        info = pltpu.get_tpu_info()
        cap = int(getattr(info, "vmem_capacity_bytes", 0))
        if cap > 0:
            return cap
    except Exception:
        pass
    return 64 << 20                      # conservative (v7x-sized) fallback


def _maybe_single_buffered(block_shape, index_map, nbytes):
    """Single-buffer large, rarely-changing operand blocks (VMEM saver on v7x)."""
    if nbytes >= (1 << 20):
        try:
            return pl.BlockSpec(block_shape, index_map, pipeline_mode=pl.Buffered(1))
        except Exception:
            pass
    return pl.BlockSpec(block_shape, index_map)


def _pick_row_tile(ho, wo, bytes_per_pixel, budget, min_tiles):
    """Largest divisor th of Ho whose (th*Wo)-row tile is legal and fits the budget."""
    cands = [th for th in range(1, ho + 1)
             if ho % th == 0 and ((th * wo) % 8 == 0 or th == ho)]
    good = [th for th in cands
            if th * wo * bytes_per_pixel <= budget and ho // th >= min_tiles]
    if good:
        return max(good)
    return min(cands)                    # smallest legal tile as a last resort


# --------------------------------------------------------------------------------------
# fused kernel: conv (one packed-K matmul) + instance norm (two-pass) + affine + LeakyReLU
# --------------------------------------------------------------------------------------
def _fused_conv_in_act_kernel(x_ref, w_ref, g_ref, b_ref, o_ref, *, inv_p):
    # x_ref: (1, P, K16) bf16   packed conv taps for one batch element
    # w_ref: (K16, CBLK) bf16   packed conv weight for one output-channel block
    # g_ref, b_ref: (1, CBLK) f32
    # o_ref: (1, P, CBLK)
    acc = jnp.dot(x_ref[0], w_ref[...], preferred_element_type=jnp.float32)   # (P, CBLK)
    mean = jnp.sum(acc, axis=0, keepdims=True) * inv_p                        # (1, CBLK)
    cen = acc - mean
    var = jnp.sum(cen * cen, axis=0, keepdims=True) * inv_p                   # centered
    scale = g_ref[...] * jax.lax.rsqrt(var + EPS)                             # (1, CBLK)
    z = cen * scale + b_ref[...]
    o_ref[0] = jnp.where(z >= 0.0, z, LEAKY_SLOPE * z).astype(o_ref.dtype)


# --------------------------------------------------------------------------------------
# two-phase path, kernel 1: conv tile (one packed-K matmul) + per-tile [sum, sum_sq]
# --------------------------------------------------------------------------------------
def _conv_stats_kernel(x_ref, w_ref, y_ref, s_ref):
    # x_ref: (1, TP, K16) bf16; w_ref: (K16, Cpad) bf16
    # y_ref: (1, TP, Cpad) conv tile (bf16); s_ref: (1, 1, 2, Cpad) f32
    acc = jnp.dot(x_ref[0], w_ref[...], preferred_element_type=jnp.float32)
    y_ref[0] = acc.astype(y_ref.dtype)
    s_ref[0, 0, pl.ds(0, 1), :] = jnp.sum(acc, axis=0, keepdims=True)
    s_ref[0, 0, pl.ds(1, 1), :] = jnp.sum(acc * acc, axis=0, keepdims=True)


# --------------------------------------------------------------------------------------
# two-phase path, kernel 2: per-channel scale/shift + LeakyReLU
# --------------------------------------------------------------------------------------
def _norm_act_kernel(y_ref, sc_ref, sh_ref, o_ref):
    z = y_ref[...].astype(jnp.float32) * sc_ref[...] + sh_ref[...]
    o_ref[...] = jnp.where(z >= 0.0, z, LEAKY_SLOPE * z).astype(o_ref.dtype)


# --------------------------------------------------------------------------------------
# wrapper
# --------------------------------------------------------------------------------------
def down_block_nhwc(x_nhwc, conv_w, gamma, beta, *, row_tile=None,
                    out_dtype=jnp.float32, conv_dtype=jnp.bfloat16):
    """DownBlock forward, channels-last.

    x_nhwc: (N, H, W, C_in); conv_w: (C_out, C_in, 4, 4); gamma/beta: (C_out,)
    Returns (N, H//2, W//2, C_out) in `out_dtype`.
    """
    n, h, w, cin = x_nhwc.shape
    cout, cin_w, kh_w, kw_w = conv_w.shape
    assert (cin_w, kh_w, kw_w) == (cin, 4, 4)
    assert h % 2 == 0 and w % 2 == 0
    ho, wo = h // 2, w // 2
    p = ho * wo
    k16 = 16 * cin
    cpad = _ceil_to(cout, LANE)

    # ---- wrapper-side relayout: pack all 16 conv taps along the contraction axis ----
    xp = jnp.pad(x_nhwc, ((0, 0), (1, 1), (1, 1), (0, 0))).astype(jnp.bfloat16)
    taps = [xp[:, kh:kh + 2 * ho:2, kw:kw + 2 * wo:2, :]
            for kh in range(4) for kw in range(4)]
    x16 = jnp.concatenate(taps, axis=-1).reshape(n, p, k16)

    # weight in matching (kh, kw, ci) row order, lane-dense padded C_out
    wk = jnp.transpose(conv_w, (2, 3, 1, 0)).reshape(k16, cout)
    wk = jnp.pad(wk, ((0, 0), (0, cpad - cout))).astype(jnp.bfloat16)

    g2 = jnp.pad(gamma.astype(jnp.float32), (0, cpad - cout),
                 constant_values=1.0).reshape(1, cpad)
    b2 = jnp.pad(beta.astype(jnp.float32), (0, cpad - cout)).reshape(1, cpad)

    cap = _vmem_capacity_bytes()
    vmem_limit = int(0.75 * cap)         # 48 MiB on 64-MiB v7x, ~96 MiB on v5e/v6e

    # ---------------- fused fast path -------------------------------------------------
    x_blk_bytes = _vmem_bytes((p, k16), jnp.bfloat16)
    fused_est = (2 * x_blk_bytes
                 + 2 * _vmem_bytes((k16, CBLK), jnp.bfloat16)
                 + 2 * _vmem_bytes((p, CBLK), out_dtype)
                 + 3 * _vmem_bytes((p, CBLK), jnp.float32)      # f32 acc + temporaries
                 + (2 << 20))
    if row_tile is None and fused_est <= int(0.8 * vmem_limit):
        n_c = cpad // CBLK
        out = pl.pallas_call(
            functools.partial(_fused_conv_in_act_kernel, inv_p=1.0 / p),
            grid=(n, n_c),
            in_specs=[
                # packed taps: block index only changes per batch element
                _maybe_single_buffered((1, p, k16), lambda i, c: (i, 0, 0), x_blk_bytes),
                pl.BlockSpec((k16, CBLK), lambda i, c: (0, c)),
                pl.BlockSpec((1, CBLK), lambda i, c: (0, c)),
                pl.BlockSpec((1, CBLK), lambda i, c: (0, c)),
            ],
            out_specs=pl.BlockSpec((1, p, CBLK), lambda i, c: (i, 0, c)),
            out_shape=jax.ShapeDtypeStruct((n, p, cpad), out_dtype),
            compiler_params=pltpu.CompilerParams(
                dimension_semantics=("parallel", "parallel"),
                vmem_limit_bytes=vmem_limit),
        )(x16, wk, g2, b2)
        return out.reshape(n, ho, wo, cpad)[..., :cout]

    # ---------------- general two-phase path ------------------------------------------
    conv_bytes = jnp.dtype(conv_dtype).itemsize
    out_bytes = jnp.dtype(out_dtype).itemsize
    wk_bytes = _vmem_bytes((k16, cpad), jnp.bfloat16)
    w_bufs = 1 if wk_bytes >= (1 << 20) else 2
    fixed = w_bufs * wk_bytes + 2 * _vmem_bytes((2, cpad), jnp.float32) + (2 << 20)
    per_pix1 = (2 * _ceil_to(k16, LANE) * 2        # bf16 lhs tile, double-buffered
                + 2 * cpad * conv_bytes            # conv-out tile, double-buffered
                + 2 * cpad * 4)                    # f32 accumulator + temporaries
    budget1 = max(int(0.8 * vmem_limit) - fixed, per_pix1 * wo * 8)
    min_tiles = 2 if n == 1 else 1                 # keep both v7x TensorCores busy
    th = row_tile if row_tile is not None else _pick_row_tile(
        ho, wo, per_pix1, budget1, min_tiles)
    assert ho % th == 0 and ((th * wo) % 8 == 0 or th == ho), (th, wo)
    n_t = ho // th
    tp = th * wo

    y, stats = pl.pallas_call(
        _conv_stats_kernel,
        grid=(n, n_t),
        in_specs=[
            pl.BlockSpec((1, tp, k16), lambda i, t: (i, t, 0)),
            _maybe_single_buffered((k16, cpad), lambda i, t: (0, 0), wk_bytes),
        ],
        out_specs=(
            pl.BlockSpec((1, tp, cpad), lambda i, t: (i, t, 0)),
            pl.BlockSpec((1, 1, 2, cpad), lambda i, t: (i, t, 0, 0)),
        ),
        out_shape=(
            jax.ShapeDtypeStruct((n, p, cpad), conv_dtype),
            jax.ShapeDtypeStruct((n, n_t, 2, cpad), jnp.float32),
        ),
        compiler_params=pltpu.CompilerParams(
            dimension_semantics=("parallel", "parallel"),
            vmem_limit_bytes=vmem_limit),
    )(x16, wk)

    # tiny cross-tile reduction + fold gamma/beta into per-(n, c) scale/shift
    tot = jnp.sum(stats, axis=1)                                  # (N, 2, Cpad)
    mean = tot[:, 0, :] / p
    var = jnp.maximum(tot[:, 1, :] / p - mean * mean, 0.0)        # guard cancellation
    rstd = jax.lax.rsqrt(var + EPS)
    scale = (g2 * rstd).reshape(n, 1, cpad)
    shift = (b2 - mean * g2 * rstd).reshape(n, 1, cpad)

    # kernel 2 tiled independently (bigger, DMA-friendly blocks)
    per_pix2 = cpad * (2 * conv_bytes + 2 * out_bytes + 4)
    budget2 = max(int(0.6 * vmem_limit), per_pix2 * wo * 8)
    th2 = _pick_row_tile(ho, wo, per_pix2, budget2, min_tiles)
    n_t2 = ho // th2
    tp2 = th2 * wo

    out = pl.pallas_call(
        _norm_act_kernel,
        grid=(n, n_t2),
        in_specs=[
            pl.BlockSpec((1, tp2, cpad), lambda i, t: (i, t, 0)),
            pl.BlockSpec((1, 1, cpad), lambda i, t: (i, 0, 0)),
            pl.BlockSpec((1, 1, cpad), lambda i, t: (i, 0, 0)),
        ],
        out_specs=pl.BlockSpec((1, tp2, cpad), lambda i, t: (i, t, 0)),
        out_shape=jax.ShapeDtypeStruct((n, p, cpad), out_dtype),
        compiler_params=pltpu.CompilerParams(
            dimension_semantics=("parallel", "parallel"),
            vmem_limit_bytes=vmem_limit),
    )(y, scale, shift)

    return out.reshape(n, ho, wo, cpad)[..., :cout]


def down_block_nchw(x_nchw, conv_w, gamma, beta, **kw):
    """NCHW adapter at the model boundary (keep activations NHWC between DownBlocks)."""
    x_nhwc = jnp.transpose(x_nchw, (0, 2, 3, 1))
    out = down_block_nhwc(x_nhwc, conv_w, gamma, beta, **kw)
    return jnp.transpose(out, (0, 3, 1, 2))


def _reference_nchw(x_nchw, conv_w, gamma, beta, *, matmul_dtype=jnp.bfloat16):
    """Pure-JAX reference (matmul_dtype=bf16 matches the kernel's MXU precision)."""
    y = jax.lax.conv_general_dilated(
        x_nchw.astype(matmul_dtype), conv_w.astype(matmul_dtype),
        window_strides=(2, 2), padding=((1, 1), (1, 1)),
        dimension_numbers=("NCHW", "OIHW", "NCHW"),
        preferred_element_type=jnp.float32)
    mean = jnp.mean(y, axis=(2, 3), keepdims=True)
    var = jnp.mean((y - mean) ** 2, axis=(2, 3), keepdims=True)
    z = (y - mean) * jax.lax.rsqrt(var + EPS) * gamma.reshape(1, -1, 1, 1) \
        + beta.reshape(1, -1, 1, 1)
    return jnp.where(z >= 0, z, LEAKY_SLOPE * z)


if __name__ == "__main__":
    key = jax.random.PRNGKey(0)
    k_x, k_w, k_g, k_b = jax.random.split(key, 4)

    N, C_IN, H, W = 2, 4, 16, 16
    C_OUT = 8

    x = jax.random.normal(k_x, (N, C_IN, H, W), dtype=jnp.float32)
    conv_w = 0.1 * jax.random.normal(k_w, (C_OUT, C_IN, 4, 4), dtype=jnp.float32)
    gamma = 1.0 + 0.1 * jax.random.normal(k_g, (C_OUT,), dtype=jnp.float32)
    beta = 0.1 * jax.random.normal(k_b, (C_OUT,), dtype=jnp.float32)

    ref_bf16 = _reference_nchw(x, conv_w, gamma, beta)
    ref_f32 = _reference_nchw(x, conv_w, gamma, beta, matmul_dtype=jnp.float32)

    # default path: fused single-pallas_call conv + instance norm + LeakyReLU
    out = down_block_nchw(x, conv_w, gamma, beta)
    jax.block_until_ready(out)
    assert out.shape == (N, C_OUT, H // 2, W // 2), out.shape
    assert jnp.allclose(out, ref_bf16, atol=2e-3, rtol=2e-3), \
        float(jnp.max(jnp.abs(out - ref_bf16)))
    assert jnp.allclose(out, ref_f32, atol=5e-2, rtol=5e-2), \
        float(jnp.max(jnp.abs(out - ref_f32)))

    # forced two-phase path (bf16 conv intermediate, tiled conv+stats kernel, cross-tile
    # fold, separate normalize/activation kernel)
    out_tiled = down_block_nchw(x, conv_w, gamma, beta, row_tile=2)
    jax.block_until_ready(out_tiled)
    assert out_tiled.shape == (N, C_OUT, H // 2, W // 2)
    assert jnp.allclose(out_tiled, ref_bf16, atol=3e-2, rtol=3e-2), \
        float(jnp.max(jnp.abs(out_tiled - ref_bf16)))
    assert jnp.allclose(out_tiled, ref_f32, atol=6e-2, rtol=6e-2), \
        float(jnp.max(jnp.abs(out_tiled - ref_f32)))

    print("KERNEL_OK")
</pallas_src>

<mosaic_0001>
module attributes {stable_mosaic.version = 11 : i64} {
  func.func @_fused_conv_in_act_kernel(%arg0: i32, %arg1: i32, %arg2: memref<1x64x64xbf16, #tpu.memory_space<vmem>>, %arg3: memref<64x128xbf16, #tpu.memory_space<vmem>>, %arg4: memref<1x128xf32, #tpu.memory_space<vmem>>, %arg5: memref<1x128xf32, #tpu.memory_space<vmem>>, %arg6: memref<1x64x128xf32, #tpu.memory_space<vmem>>) attributes {dimension_semantics = [#tpu.dimension_semantics<parallel>, #tpu.dimension_semantics<parallel>], iteration_bounds = array<i64: 2, 1>, scalar_prefetch = 0 : i64, scratch_operands = 0 : i64, tpu.core_type = #tpu.core_type<tc>, window_params = [{transform_indices = @transform_0, window_bounds = array<i64: 1, 64, 64>}, {transform_indices = @transform_1, window_bounds = array<i64: 64, 128>}, {transform_indices = @transform_2, window_bounds = array<i64: 1, 128>}, {transform_indices = @transform_3, window_bounds = array<i64: 1, 128>}, {transform_indices = @transform_4, window_bounds = array<i64: 1, 64, 128>}]} {
    %c0 = arith.constant 0 : index
    %c0_0 = arith.constant 0 : index
    %c0_1 = arith.constant 0 : index
    %0 = vector.load %arg2[%c0, %c0_0, %c0_1] : memref<1x64x64xbf16, #tpu.memory_space<vmem>>, vector<1x64x64xbf16>
    %1 = vector.shape_cast %0 : vector<1x64x64xbf16> to vector<64x64xbf16>
    %c0_2 = arith.constant 0 : index
    %c0_3 = arith.constant 0 : index
    %2 = vector.load %arg3[%c0_2, %c0_3] : memref<64x128xbf16, #tpu.memory_space<vmem>>, vector<64x128xbf16>
    %cst = arith.constant dense<0.000000e+00> : vector<64x128xf32>
    %3 = tpu.matmul %1, %2, %cst {dimension_numbers = #tpu.dot_dimension_numbers<[1], [0], [0], [1], [0, 0, 1, 1], [], []>} : vector<64x64xbf16>, vector<64x128xbf16>, vector<64x128xf32> -> vector<64x128xf32>
    %cst_4 = arith.constant dense<0.000000e+00> : vector<128xf32>
    %4 = vector.multi_reduction <add>, %3, %cst_4 [0] : vector<64x128xf32> to vector<128xf32>
    %5 = vector.shape_cast %4 : vector<128xf32> to vector<1x128xf32>
    %cst_5 = arith.constant 1.562500e-02 : f32
    %6 = vector.broadcast %cst_5 : f32 to vector<1x128xf32>
    %7 = arith.mulf %5, %6 : vector<1x128xf32>
    %8 = vector.broadcast %7 : vector<1x128xf32> to vector<64x128xf32>
    %9 = arith.subf %3, %8 : vector<64x128xf32>
    %10 = arith.mulf %9, %9 : vector<64x128xf32>
    %cst_6 = arith.constant dense<0.000000e+00> : vector<128xf32>
    %11 = vector.multi_reduction <add>, %10, %cst_6 [0] : vector<64x128xf32> to vector<128xf32>
    %12 = vector.shape_cast %11 : vector<128xf32> to vector<1x128xf32>
    %cst_7 = arith.constant 1.562500e-02 : f32
    %13 = vector.broadcast %cst_7 : f32 to vector<1x128xf32>
    %14 = arith.mulf %12, %13 : vector<1x128xf32>
    %c0_8 = arith.constant 0 : index
    %c0_9 = arith.constant 0 : index
    %15 = vector.load %arg4[%c0_8, %c0_9] : memref<1x128xf32, #tpu.memory_space<vmem>>, vector<1x128xf32>
    %cst_10 = arith.constant 9.99999974E-6 : f32
    %16 = vector.broadcast %cst_10 : f32 to vector<1x128xf32>
    %17 = arith.addf %14, %16 : vector<1x128xf32>
    %18 = math.rsqrt %17 : vector<1x128xf32>
    %19 = arith.mulf %15, %18 : vector<1x128xf32>
    %20 = vector.broadcast %19 : vector<1x128xf32> to vector<64x128xf32>
    %21 = arith.mulf %9, %20 : vector<64x128xf32>
    %c0_11 = arith.constant 0 : index
    %c0_12 = arith.constant 0 : index
    %22 = vector.load %arg5[%c0_11, %c0_12] : memref<1x128xf32, #tpu.memory_space<vmem>>, vector<1x128xf32>
    %23 = vector.broadcast %22 : vector<1x128xf32> to vector<64x128xf32>
    %24 = arith.addf %21, %23 : vector<64x128xf32>
    %cst_13 = arith.constant 0.000000e+00 : f32
    %25 = vector.broadcast %cst_13 : f32 to vector<64x128xf32>
    %26 = arith.cmpf oge, %24, %25 : vector<64x128xf32>
    %cst_14 = arith.constant 2.000000e-01 : f32
    %27 = vector.broadcast %cst_14 : f32 to vector<64x128xf32>
    %28 = arith.mulf %27, %24 : vector<64x128xf32>
    %29 = arith.select %26, %24, %28 : vector<64x128xi1>, vector<64x128xf32>
    %c0_15 = arith.constant 0 : index
    %c0_16 = arith.constant 0 : index
    %c0_17 = arith.constant 0 : index
    %30 = vector.load %arg6[%c0_15, %c0_16, %c0_17] : memref<1x64x128xf32, #tpu.memory_space<vmem>>, vector<1x64x128xf32>
    %31 = vector.shape_cast %30 : vector<1x64x128xf32> to vector<64x128xf32>
    %32 = vector.shape_cast %29 : vector<64x128xf32> to vector<1x64x128xf32>
    tpu.vector_store %arg6[%c0_15, %c0_16, %c0_17], %32 {strides = array<i32>} : memref<1x64x128xf32, #tpu.memory_space<vmem>>, vector<1x64x128xf32>,
    return
  }
  func.func @transform_0(%arg0: i32, %arg1: i32) -> (i32, i32, i32) {
    %c0_i32 = arith.constant 0 : i32
    %c0_i32_0 = arith.constant 0 : i32
    %c0_i32_1 = arith.constant 0 : i32
    return %arg0, %c0_i32, %c0_i32_0 : i32, i32, i32
  }
  func.func @transform_1(%arg0: i32, %arg1: i32) -> (i32, i32) {
    %c0_i32 = arith.constant 0 : i32
    %c0_i32_0 = arith.constant 0 : i32
    return %c0_i32, %arg1 : i32, i32
  }
  func.func @transform_2(%arg0: i32, %arg1: i32) -> (i32, i32) {
    %c0_i32 = arith.constant 0 : i32
    %c0_i32_0 = arith.constant 0 : i32
    return %c0_i32, %arg1 : i32, i32
  }
  func.func @transform_3(%arg0: i32, %arg1: i32) -> (i32, i32) {
    %c0_i32 = arith.constant 0 : i32
    %c0_i32_0 = arith.constant 0 : i32
    return %c0_i32, %arg1 : i32, i32
  }
  func.func @transform_4(%arg0: i32, %arg1: i32) -> (i32, i32, i32) {
    %c0_i32 = arith.constant 0 : i32
    %c0_i32_0 = arith.constant 0 : i32
    return %arg0, %c0_i32, %arg1 : i32, i32, i32
  }
}

</mosaic_0001>

<bundles_post_ra>
// kernel: tpu_custom_call.1
= control target key start
LH: loop header
LB: loop body
LE: loop exit
PB: predicated region body
PF: predicated region fallthrough
CT: control target
= control target key end

     0   :  { %9 = vsyncpa [#allocation3], 0  ;;  %s1237_s0 = inlined_call_operand.hbm [shape: bf16[2,64,64], index: 0, kind: input, shape index: {}]   ;;  %s1238_s1 = inlined_call_operand.hbm [shape: bf16[64,128], index: 1, kind: input, shape index: {}]   ;;  %s1239_s2 = inlined_call_operand.vmem [shape: f32[1,128], index: 2, kind: input, shape index: {}]   ;;  %s1240_s3 = inlined_call_operand.vmem [shape: f32[1,128], index: 3, kind: input, shape index: {}]   ;;  %s1241_s4 = inlined_call_operand.hbm [shape: f32[2,64,128], index: 4, kind: output, shape index: {}]  }
   0x1   :  { %11 = vsyncpa [#allocation3 + $0x1], 0 }
   0x2   :  { %12 = vsyncpa [#allocation6], 0 }
   0x3   :  { %13 = vsyncpa [#allocation4], 0 }
   0x4   :  { %15 = vsyncpa [#allocation4 + $0x1], 0  ;;  %s993_s15 = smov 0   ;;  %s995_s16 = smov 0  }
   0x5   :  { %s997_s17 = smov 0   ;;  %s999_s18 = smov 0  }
   0x6   :  { %s1001_s19 = smov 0   ;;  %s1003_s20 = smov 0  }
   0x7 LB: > { %s662_s21 = sadd.s32 4294967295, %s959_s20   ;;  %s663_s22 = sadd.s32 4294967294, %s959_s20   ;;  %s959_s20 = sphi %s1003_s20, %s21_s20   ;;  %s955_s19 = sphi %s1001_s19, %s1265_s19   ;;  %s951_s18 = sphi %s999_s18, %s1264_s18   ;;  %s947_s17 = sphi %s997_s17, %s1263_s17   ;;  %s943_s16 = sphi %s995_s16, %s1262_s16   ;;  %s939_s15 = sphi %s993_s15, %s1261_s15  }
   0x8   : > { %p53_p0 = scmp.ne.s32.totalorder %s943_s16, %s939_s15  ;;  %p1027_p1 = scmp.eq.s32.totalorder %s662_s21, 0 }
   0x9   : > { %p1031_p2 = scmp.eq.s32.totalorder %s662_s21, 1  ;;  %p163_p3 = scmp.eq.s32.totalorder %s663_s22, 1 }
   0xa   : > { %s1246_s23 = scalar_select %p1027_p1, 1, 0 }
   0xb   : > { %s1247_s24 = scalar_select %p1031_p2, 1, 0 }
   0xc   : > { %p1037_p4 = por %p1027_p1, %p53_p0  ;;  %p664_p5 = scmp.ge.s32.totalorder %s959_s20, 1 }
   0xd   : > { %p1042_p6 = por %p163_p3, %p53_p0  ;;  %p170_p7 = scmp.lt.s32.totalorder %s959_s20, 3 }
   0xe   : > { %s1248_s25 = scalar_select %p1037_p4, 1, 0 }
   0xf   : > { %s1249_s26 = scalar_select %p1042_p6, 1, 0 }
  0x10   : > { %p1047_p8 = pnand %p664_p5, %p170_p7  ;;  %s961_s28 = smov [#allocation5]  }
  0x11   : > { %s184_s29 = sshll.u32 %s961_s28, 4  ;;  %s33_s5 = sadd.s32 1, %s955_s19  ;;  %s185_s29 = int_to_ptr.vmem [resolvable:$true] %s184_s29 }
  0x12   : > { %s1250_s27 = scalar_select %p1047_p8, 1, 0 }
  0x13   : > { %p736_p9 = pneg %p1047_p8  ;;  %s815_s8 = scalar_lea.hbm %s1238_s1, 512 }
  0x14   : > { %p816_p12 = scmp.ne.s32.totalorder %s1238_s1, %s815_s8  ;;  %p822_p5 = scmp.lt.u32.totalorder %s815_s8, %s1238_s1 }
  0x15   : > { %p1056_p11 = pnand %p736_p9, %p1027_p1 }
  0x17   : > { %p817_p13 = pneg %p1056_p11 }
  0x19   : > { %p818_p0 = pnand %p817_p13, %p816_p12 }
  0x1b   : > { %p819_p3 = pneg %p818_p0 }
  0x1d   : > { %p824_p7 = pnand %p822_p5, %p819_p3 }
  0x1f   : > { %827 = shalt.err (!%p824_p7)
}
  0x20   : > { %s828_s13 = scalar_lea.vmem %s185_s29, 512  ;;  %p836_p1 = scmp.lt.s32.totalorder %s185_s29, %s185_s29 }
  0x21   : > { %p829_p9 = scmp.ne.s32.totalorder %s185_s29, %s828_s13  ;;  %p837_p4 = scmp.lt.s32.totalorder %s828_s13, %s828_s13 }
  0x23   : > { %p831_p10 = pnand %p829_p9, %p817_p13  ;;  %p838_p8 = por %p837_p4, %p836_p1 }
  0x25   : > { %p832_p6 = pneg %p831_p10 }
  0x27   : > { %p839_p2 = pnand %p838_p8, %p832_p6 }
  0x29   : > { %842 = shalt.err (!%p839_p2)
}
  0x2a   : > { %s962_s14 = smov 64   ;;  %s963_s21 = smov 4  }
  0x2b   : > { %739 = dma.hbm_to_vmem [thread:$0]  (!%p1056_p11), %s1238_s1, 512, %s185_s29, [#allocation6], %s962_s14, %s962_s14, %s963_s21  }
  0x2c   : > { %p35_p1 = scmp.ge.s32.totalorder %s33_s5, 2  ;;  %s40_s6 = sadd.s32 1, %s947_s17 }
  0x2d   : > { %p47_p2 = scmp.ne.s32.totalorder %s947_s17, %s943_s16  ;;  %p48_p4 = scmp.eq.s32.totalorder %s959_s20, 0 }
  0x2e   : > { %s1267_s5 = smov (%p35_p1, %s33_s5), 0  ;;  %p1253_p8 = scmp.ne.s32.totalorder %s1247_s24, 0 }
  0x2f   : > { %p1086_p6 = por %p48_p4, %p47_p2  ;;  %s37_s8 = ssub.s32 %s955_s19, %s1267_s5 }
  0x30   : > { %p1092_p10 = por %p1253_p8, %p47_p2  ;;  %p749_p12 = scmp.lt.s32.totalorder %s959_s20, 2 }
  0x31   : > { %p38_p11 = scmp.eq.s32.totalorder %s37_s8, 0  ;;  %s210_s29 = sand.u32 1, %s947_s17  }
  0x32   : > { %s669_s9 = sshll.u32 %s210_s29, 5  ;;  %s694_s11 = sshll.u32 %s955_s19, 9 }
  0x33   : > { %s1101_s10 = scalar_select %p38_p11, %s947_s17, %s40_s6  }
  0x34   : > { %s1107_s22 = scalar_lea.hbm %s1237_s0, %s694_s11  ;;  %s214_s24 = scalar_lea.vmem [#allocation2], %s669_s9 }
  0x35   : > { %s221_s28 = sshll.u32 %s214_s24, 4  ;;  %p1113_p13 = pnand %p749_p12, %p1086_p6  ;;  %s1109_s28 = int_to_ptr.vmem [resolvable:$true] %s221_s28 }
  0x36   : > { %s1117_s6 = scalar_lea.sflag [#allocation3], %s210_s29  ;;  %s843_s12 = scalar_lea.hbm %s1107_s22, 512 }
  0x37   : > { %p844_p0 = scmp.ne.s32.totalorder %s1107_s22, %s843_s12  ;;  %p845_p3 = pneg %p1113_p13 }
  0x38   : > { %s848_s7 = scalar_lea.hbm %s1237_s0, 1024  ;;  %p849_p9 = scmp.lt.u32.totalorder %s1107_s22, %s1237_s0 }
  0x39   : > { %p846_p5 = pnand %p845_p3, %p844_p0  ;;  %p850_p1 = scmp.lt.u32.totalorder %s848_s7, %s843_s12 }
  0x3a   : > { %p852_p4 = scmp.lt.u32.totalorder %s843_s12, %s1107_s22 }
  0x3b   : > { %p847_p7 = pneg %p846_p5  ;;  %p851_p2 = por %p850_p1, %p849_p9 }
  0x3d   : > { %p853_p6 = por %p852_p4, %p851_p2 }
  0x3f   : > { %p854_p8 = pnand %p853_p6, %p847_p7 }
  0x41   : > { %857 = shalt.err (!%p854_p8)
}
  0x42   : > { %s858_s29 = scalar_lea.vmem %s1109_s28, 512  ;;  %s964_s9 = smov [#allocation2]  }
  0x43   : > { %p859_p12 = scmp.ne.s32.totalorder %s1109_s28, %s858_s29  ;;  %s863_s11 = sshll.u32 %s964_s9, 4  ;;  %s864_s11 = int_to_ptr.vmem [resolvable:$false] %s863_s11 }
  0x44   : > { %s865_s13 = scalar_lea.vmem %s864_s11, 1024  ;;  %p866_p5 = scmp.lt.s32.totalorder %s1109_s28, %s864_s11 }
  0x45   : > { %p861_p11 = pnand %p859_p12, %p845_p3  ;;  %p867_p9 = scmp.lt.s32.totalorder %s865_s13, %s858_s29 }
  0x47   : > { %p862_p0 = pneg %p861_p11  ;;  %p868_p1 = por %p867_p9, %p866_p5 }
  0x49   : > { %p869_p2 = pnand %p868_p1, %p862_p0 }
  0x4b   : > { %872 = shalt.err (!%p869_p2)
}
  0x4c   : > { %743 = dma.hbm_to_vmem [thread:$0]  (!%p1113_p13), %s1107_s22, 512, %s1109_s28, %s1117_s6, %s962_s14, %s962_s14, %s963_s21  }
  0x4d   : > { %p1256_p3 = scmp.ne.s32.totalorder %s1250_s27, 0 }
  0x4e   : > { %s1151_s12 = sand.u32 (!%p1256_p3), 1, %s943_s16   ;;  %p1257_p7 = scmp.ne.s32.totalorder (!%p1256_p3), %s1248_s25, 0 }
  0x4f   : > { %233 = sbr.rel (%p1256_p3) target bundleno = 427 (0x1ab), region = 36  ;;  %s673_s7 = sshll.u32 (!%p1256_p3), %s1151_s12, 5 }
  0x50   : > { %s236_s24 = scalar_lea.sflag (!%p1256_p3), [#allocation3], %s1151_s12  ;;  %s239_s29 = scalar_lea.vmem (!%p1256_p3), [#allocation2], %s673_s7 }
  0x56   : > { %926 = dma.done.wait (%p1257_p7), %s236_s24, 512  }
  0x57   : > { %928 = vsyncadd (%p1257_p7), %s236_s24, 4294966784  ;;  %p1258_p4 = scmp.ne.s32.totalorder %s1246_s23, 0 }
  0x59   : > { %930 = dma.done.wait (%p1258_p4), [#allocation6], 512  }
  0x5a   : > { %932 = vsyncadd (%p1258_p4), [#allocation6], 4294966784  ;;  %v805_v0 = vld [vmem:[#allocation5] sm:$0xff]   ;;  %v806_v1 = vld [vmem:[#allocation5 + $0x8] sm:$0xff]   ;;  %vm341_vm0 = vcmask 523264   ;;  %v468_v61 = vlaneseq  ;;  %s675_s27 = sshll.u32 %s1151_s12, 6 }
  0x5b   : > { %704 = vmatprep.subr.bf16.mxu0 %v805_v0  ;;  %720 = vmatprep.subr.bf16.mxu1 %v805_v0  ;;  %v807_v2 = vld [vmem:[#allocation5 + $0x10] sm:$0xff]   ;;  %v809_v3 = vld [vmem:[%s239_s29] sm:$0xff]   ;;  %v808_v5 = vld [vmem:[#allocation5 + $0x18] sm:$0xff]   ;;  %s695_s22 = sshll.u32 %s951_s18, 10  ;;  %s273_s28 = scalar_lea.vmem [#allocation7], %s675_s27 }
  0x5c   : > { %705 = vmatpush3.bf16.msra.mxu0 %v805_v0  ;;  %724 = vmatpush3.bf16.msra.mxu1 %v805_v0  ;;  %v811_v4 = vld [vmem:[%s239_s29 + $0x10] sm:$0xff]   ;;  %v810_v6 = vld [vmem:[%s239_s29 + $0x8] sm:$0xff]   ;;  %v812_v7 = vld [vmem:[%s239_s29 + $0x18] sm:$0xff]   ;;  %v469_v62 = vshrl.u32 %v468_v61, 7  ;;  %s543_s8 = sshll.u32 %s273_s28, 4  ;;  %s1180_s9 = scalar_lea.hbm %s1241_s4, %s695_s22  ;;  %s1182_s8 = int_to_ptr.vmem [resolvable:$true] %s543_s8 }
  0x5d   : > { %706 = vmatprep.subr.bf16.mxu0 %v806_v1  ;;  %721 = vmatprep.subr.bf16.mxu1 %v806_v1  ;;  %v463_v63 = vld [vmem:[%s1239_s2] sm:$0x1]  ;;  %s529_s11 = scalar_lea.sflag [#allocation4], %s1151_s12  ;;  %s873_s13 = scalar_lea.vmem %s1182_s8, 1024 }
  0x5e   : > { %712 = vmatprep.mubr.msk.bf16.mxu0 %vm341_vm0, %v809_v3  ;;  %716 = vmatprep.mubr.msk.bf16.mxu1 %vm341_vm0, %v811_v4  ;;  %v470_v0 = vsub.s32 0, %v469_v62  ;;  %v688_v4 = vld [vmem:[%s1240_s3] ss:$0 sm:$0xff]  ;;  %p874_p13 = scmp.ne.s32.totalorder %s1182_s8, %s873_s13  ;;  %s965_s7 = smov [#allocation7]  }
  0x5f   : > { %s877_s24 = sshll.u32 %s965_s7, 4  ;;  %s878_s24 = int_to_ptr.vmem [resolvable:$false] %s877_s24 }
  0x60   : > { %707 = vmatpush3.bf16.msra.mxu0 %v806_v1  ;;  %725 = vmatpush3.bf16.msra.mxu1 %v806_v1  ;;  %p875_p6 = pnand %p874_p13, %p1092_p10  ;;  %s879_s29 = scalar_lea.vmem %s878_s24, 2048 }
  0x61   : > { %708 = vmatprep.subr.bf16.mxu0 %v807_v2  ;;  %722 = vmatprep.subr.bf16.mxu1 %v807_v2  ;;  %p880_p12 = scmp.lt.s32.totalorder %s1182_s8, %s878_s24  ;;  %p881_p11 = scmp.lt.s32.totalorder %s879_s29, %s873_s13 }
  0x62   : > { %p876_p8 = pneg %p875_p6 }
  0x63   : > { %p882_p0 = por %p881_p11, %p880_p12 }
  0x64   : > { %709 = vmatpush3.bf16.msra.mxu0 %v807_v2  ;;  %726 = vmatpush3.bf16.msra.mxu1 %v807_v2 }
  0x65   : > { %710 = vmatprep.subr.bf16.mxu0 %v808_v5  ;;  %723 = vmatprep.subr.bf16.mxu1 %v808_v5  ;;  %p883_p5 = pnand %p882_p0, %p876_p8 }
  0x68   : > { %711 = vmatpush3.bf16.msra.mxu0 %v808_v5  ;;  %727 = vmatpush3.bf16.msra.mxu1 %v808_v5 }
  0x6b   : > { %713 = vmatmul.mubr.msk.bf16.vlgmr.msra.gmra.mrb[0].mxu0 %vm341_vm0, %v810_v6  ;;  %717 = vmatmul.mubr.msk.bf16.vlgmr.msra.gmra.mrb[0].mxu1 %vm341_vm0, %v812_v7 }
 0x13e   : > { %v714_v8 = vpop.f32.mrb[0].mxu0  ;;  %v718_v9 = vpop.f32.mrb[0].mxu1 }
 0x13f   : > { %v388_v10 = vpop.f32.mrb[1].mxu0  ;;  %v404_v11 = vpop.f32.mrb[1].mxu1 }
 0x140   : > { %v715_v12 = vpop.f32.mrb[2].mxu0  ;;  %v719_v13 = vpop.f32.mrb[2].mxu1 }
 0x141   : > { %v391_v14 = vpop.f32.mrb[3].mxu0  ;;  %v407_v15 = vpop.f32.mrb[3].mxu1 }
 0x142   : > { %v419_v16 = vadd.f32 %v391_v14, %v388_v10 }
 0x144   : > { %v420_v17 = vadd.f32 %v714_v8, %v419_v16 }
 0x146   : > { %v421_v18 = vadd.f32 %v715_v12, %v420_v17 }
 0x148   : > { %v422_v19 = vadd.f32 %v421_v18, %v404_v11 }
 0x14a   : > { %v423_v20 = vadd.f32 %v422_v19, %v407_v15 }
 0x14c   : > { %v424_v21 = vadd.f32 %v718_v9, %v423_v20 }
 0x14e   : > { %v425_v22 = vadd.f32 %v719_v13, %v424_v21 }
 0x150   : > { %v426_v23 = vrot.slane %v425_v22, 4 }
 0x152   : > { %v427_v24 = vadd.f32 %v426_v23, %v425_v22 }
 0x154   : > { %v428_v25 = vrot.slane %v427_v24, 2 }
 0x156   : > { %v429_v26 = vadd.f32 %v428_v25, %v427_v24 }
 0x158   : > { %v430_v27 = vrot.slane %v429_v26, 1 }
 0x15a   : > { %v431_v28 = vadd.f32 %v430_v27, %v429_v26 }
 0x15c   : > { %v432_v29 = vmul.f32 0.015625, %v431_v28 }
 0x15e   : > { %v433_v30 = vsub.f32 %v388_v10, %v432_v29  ;;  %v434_v31 = vsub.f32 %v391_v14, %v432_v29  ;;  %v435_v32 = vsub.f32 %v714_v8, %v432_v29  ;;  %v436_v33 = vsub.f32 %v715_v12, %v432_v29 }
 0x15f   : > { %v437_v34 = vsub.f32 %v404_v11, %v432_v29  ;;  %v438_v35 = vsub.f32 %v407_v15, %v432_v29  ;;  %v439_v36 = vsub.f32 %v718_v9, %v432_v29  ;;  %v440_v37 = vsub.f32 %v719_v13, %v432_v29 }
 0x160   : > { %v441_v38 = vmul.f32 %v433_v30, %v433_v30  ;;  %v442_v39 = vmul.f32 %v434_v31, %v434_v31  ;;  %v443_v40 = vmul.f32 %v435_v32, %v435_v32  ;;  %v444_v42 = vmul.f32 %v436_v33, %v436_v33 }
 0x161   : > { %v445_v44 = vmul.f32 %v437_v34, %v437_v34  ;;  %v446_v46 = vmul.f32 %v438_v35, %v438_v35  ;;  %v447_v48 = vmul.f32 %v439_v36, %v439_v36  ;;  %v448_v50 = vmul.f32 %v440_v37, %v440_v37 }
 0x162   : > { %v449_v41 = vadd.f32 %v442_v39, %v441_v38 }
 0x164   : > { %v450_v43 = vadd.f32 %v449_v41, %v443_v40 }
 0x166   : > { %v451_v45 = vadd.f32 %v450_v43, %v444_v42 }
 0x168   : > { %v452_v47 = vadd.f32 %v451_v45, %v445_v44 }
 0x16a   : > { %v453_v49 = vadd.f32 %v452_v47, %v446_v46 }
 0x16c   : > { %v454_v51 = vadd.f32 %v453_v49, %v447_v48 }
 0x16e   : > { %v455_v52 = vadd.f32 %v454_v51, %v448_v50 }
 0x170   : > { %v456_v53 = vrot.slane %v455_v52, 4 }
 0x172   : > { %v457_v54 = vadd.f32 %v456_v53, %v455_v52 }
 0x174   : > { %v458_v55 = vrot.slane %v457_v54, 2 }
 0x176   : > { %v459_v56 = vadd.f32 %v458_v55, %v457_v54 }
 0x178   : > { %v460_v57 = vrot.slane %v459_v56, 1 }
 0x17a   : > { %v461_v58 = vadd.f32 %v460_v57, %v459_v56 }
 0x17c   : > { %v462_v59 = vmul.f32 0.015625, %v461_v58 }
 0x17e   : > { %v464_v60 = vadd.f32 1e-05, %v462_v59 }
 0x180   : > { %813 = vrsqrt.f32 %v464_v60 }
 0x18a   : > { %v814_v1 = vpop.eup %813 }
 0x18b   : > { %v466_v2 = vmul.f32 %v814_v1, %v463_v63 }
 0x18d   : > { %v471_v3 = vrot.slane %v466_v2, %v470_v0 }
 0x18f   : > { %v473_v5 = vmul.f32 %v471_v3, %v433_v30  ;;  %v474_v6 = vmul.f32 %v471_v3, %v434_v31  ;;  %v475_v7 = vmul.f32 %v471_v3, %v435_v32  ;;  %v476_v8 = vmul.f32 %v471_v3, %v436_v33 }
 0x190   : > { %v477_v9 = vmul.f32 %v471_v3, %v437_v34  ;;  %v478_v10 = vmul.f32 %v471_v3, %v438_v35  ;;  %v479_v11 = vmul.f32 %v471_v3, %v439_v36  ;;  %v480_v12 = vmul.f32 %v471_v3, %v440_v37 }
 0x191   : > { %v488_v13 = vadd.f32 %v688_v4, %v473_v5  ;;  %v489_v14 = vadd.f32 %v688_v4, %v474_v6  ;;  %v490_v15 = vadd.f32 %v688_v4, %v475_v7  ;;  %v491_v16 = vadd.f32 %v688_v4, %v476_v8 }
 0x192   : > { %v492_v17 = vadd.f32 %v688_v4, %v477_v9  ;;  %v493_v18 = vadd.f32 %v688_v4, %v478_v10  ;;  %v494_v19 = vadd.f32 %v688_v4, %v479_v11  ;;  %v495_v20 = vadd.f32 %v688_v4, %v480_v12 }
 0x193   : > { %vm496_vm1 = vcmp.ge.f32.partialorder %v488_v13, 0.0  ;;  %vm497_vm2 = vcmp.ge.f32.partialorder %v489_v14, 0.0  ;;  %vm498_vm3 = vcmp.ge.f32.partialorder %v490_v15, 0.0  ;;  %vm499_vm4 = vcmp.ge.f32.partialorder %v491_v16, 0.0 }
 0x194   : > { %vm500_vm5 = vcmp.ge.f32.partialorder %v492_v17, 0.0  ;;  %vm501_vm6 = vcmp.ge.f32.partialorder %v493_v18, 0.0  ;;  %vm502_vm7 = vcmp.ge.f32.partialorder %v494_v19, 0.0  ;;  %vm503_vm8 = vcmp.ge.f32.partialorder %v495_v20, 0.0 }
 0x195   : > { %v504_v21 = vmul.f32 0.2, %v488_v13  ;;  %v505_v22 = vmul.f32 0.2, %v489_v14  ;;  %v506_v23 = vmul.f32 0.2, %v490_v15 }
 0x196   : > { %v507_v24 = vmul.f32 0.2, %v491_v16  ;;  %v508_v25 = vmul.f32 0.2, %v492_v17  ;;  %v509_v26 = vmul.f32 0.2, %v493_v18 }
 0x197   : > { %v510_v27 = vmul.f32 0.2, %v494_v19  ;;  %v511_v28 = vmul.f32 0.2, %v495_v20  ;;  %v512_v29 = vsel %vm496_vm1, %v488_v13, %v504_v21  ;;  %v513_v30 = vsel %vm497_vm2, %v489_v14, %v505_v22 }
 0x198   : > { %v514_v31 = vsel %vm498_vm3, %v490_v15, %v506_v23  ;;  %v515_v32 = vsel %vm499_vm4, %v491_v16, %v507_v24  ;;  %v516_v33 = vsel %vm500_vm5, %v492_v17, %v508_v25  ;;  %v517_v34 = vsel %vm501_vm6, %v493_v18, %v509_v26  ;;  %520 = vst [vmem:[%s273_s28] sm:$0xff] %v512_v29 }
 0x199   : > { %521 = vst [vmem:[%s273_s28 + $0x8] sm:$0xff] %v513_v30  ;;  %v518_v35 = vsel %vm502_vm7, %v494_v19, %v510_v27  ;;  %v519_v36 = vsel %vm503_vm8, %v495_v20, %v511_v28  ;;  %522 = vst [vmem:[%s273_s28 + $0x10] sm:$0xff] %v514_v31 }
 0x19a   : > { %523 = vst [vmem:[%s273_s28 + $0x18] sm:$0xff] %v515_v32  ;;  %524 = vst [vmem:[%s273_s28 + $0x20] sm:$0xff] %v516_v33 }
 0x19b   : > { %525 = vst [vmem:[%s273_s28 + $0x28] sm:$0xff] %v517_v34  ;;  %526 = vst [vmem:[%s273_s28 + $0x30] sm:$0xff] %v518_v35 }
 0x19c   : > { %527 = vst [vmem:[%s273_s28 + $0x38] sm:$0xff] %v519_v36 }
 0x19d   : > { %886 = shalt.err (!%p883_p5)
}
 0x19e   : > { %s887_s23 = scalar_lea.hbm %s1180_s9, 1024  ;;  %s891_s14 = scalar_lea.hbm %s1241_s4, 2048 }
 0x19f   : > { %p888_p9 = scmp.ne.s32.totalorder %s1180_s9, %s887_s23  ;;  %p892_p3 = scmp.lt.u32.totalorder %s1180_s9, %s1241_s4 }
 0x1a0   : > { %p893_p7 = scmp.lt.u32.totalorder %s891_s14, %s887_s23  ;;  %p895_p13 = scmp.lt.u32.totalorder %s887_s23, %s1180_s9 }
 0x1a1   : > { %p889_p1 = pnand %p888_p9, %p1092_p10 }
 0x1a2   : > { %p894_p4 = por %p893_p7, %p892_p3 }
 0x1a3   : > { %p890_p2 = pneg %p889_p1 }
 0x1a4   : > { %p896_p6 = por %p895_p13, %p894_p4 }
 0x1a6   : > { %p897_p8 = pnand %p896_p6, %p890_p2 }
 0x1a8   : > { %900 = shalt.err (!%p897_p8)
}
 0x1a9   : > { %s966_s28 = smov 128   ;;  %s967_s6 = smov 8  }
 0x1aa   : > { %734 = dma.vmem_to_hbm [thread:$0]  (%p1092_p10), %s1182_s8, 1024, %s1180_s9, %s529_s11, %s966_s28, %s966_s28, %s967_s6  }
 0x1ab PF: > { %s558_s18 = sand.u32 1, %s939_s15   ;;  %p1259_p12 = scmp.ne.s32.totalorder %s1249_s26, 0 }
 0x1ac   : > { %p1260_p11 = scmp.ge.s32.totalorder %s959_s20, 2  ;;  %s559_s13 = scalar_lea.sflag [#allocation4], %s558_s18 }
 0x1ae   : > { %p745_p0 = pnand %p1260_p11, %p1259_p12 }
 0x1b0   : > { %934 = dma.done.wait (!%p745_p0), %s559_s13, 1024  }
 0x1b1   : > { %936 = vsyncadd (!%p745_p0), %s559_s13, 4294966272  ;;  %s21_s20 = sadd.s32 1, %s959_s20   ;;  %s1261_s15 = smov %s943_s16 }
 0x1b2   : > { %p18_p5 = scmp.ge.s32.totalorder %s21_s20, 4   ;;  %s1262_s16 = smov %s947_s17 }
 0x1b3   : > { %s1263_s17 = smov %s1101_s10  ;;  %s1264_s18 = smov %s955_s19 }
 0x1b4   : > { %s1265_s19 = smov %s1267_s5  ;;  %20 = sbr.rel (!%p18_p5) target bundleno = 7 (0x7), region = 92 }
 0x1bb   :  { %564 = vsyncpa [#allocation3], 1 }
 0x1bc   :  { %566 = vsyncpa [#allocation3 + $0x1], 1 }
 0x1bd   :  { %567 = vsyncpa [#allocation6], 1 }
 0x1be   :  { %568 = vsyncpa [#allocation4], 1 }
 0x1bf   :  { %570 = vsyncpa [#allocation4 + $0x1], 1 }

</bundles_post_ra>
